<compile_context>
chip_gen: v6e
topology: v6e:2x2x1
jax: 0.10.0
libtpu: 0.0.40
codegen_flags: <defaults>
</compile_context>

<pallas_src>
import jax
import jax.numpy as jnp
from jax.experimental import pallas as pl
from jax.experimental.pallas import tpu as pltpu

LANES = 128                      # vreg lane width
MAX_TILE_ROWS = 16384            # 16384 * 128 * 4 B = 8 MiB per f32 block
TARGET_GRID_STEPS = 4            # give v7x's 2 TensorCores >= 2 steps each
VMEM_LIMIT_BYTES = 48 * 1024 * 1024


def _round_up(a: int, b: int) -> int:
    return ((a + b - 1) // b) * b


def _sublane_granule(dtype) -> int:
    # Sub-32-bit dtypes pack along sublanes; keep blocks full-width.
    return {4: 8, 2: 16, 1: 32}.get(jnp.dtype(dtype).itemsize, 8)


def linear_kernel(wb_ref, x_ref, o_ref):
    # wb_ref: SMEM (2,)  -> [w, b] scalars
    # x_ref : VMEM (tile_rows, 128) lane-dense slab of inputs
    # o_ref : VMEM (tile_rows, 128) lane-dense slab of outputs
    w = wb_ref[0]
    b = wb_ref[1]
    # Pure VPU fused multiply-add, already in the output dtype.
    o_ref[...] = x_ref[...] * w + b


def _linear_forward(x, weight, bias):
    """x: [N, in=1], weight: [out=1, in=1], bias: [out=1] -> [N, out=1]."""
    n, in_features = x.shape
    out_features, _ = weight.shape
    dtype = x.dtype

    total = n * in_features                      # == n (in_features == 1)
    if total == 0:                               # degenerate empty batch
        return jnp.zeros((n, out_features), dtype)

    granule = _sublane_granule(dtype)

    # Lane-dense slab. Fast path (total % 128 == 0): pure reshape, zero copy.
    x_flat = x.reshape(-1)
    pad = _round_up(total, LANES) - total
    if pad:                                      # ragged tail: <128 elements
        x_flat = jnp.pad(x_flat, (0, pad))
    rows = (total + pad) // LANES
    x_slab = x_flat.reshape(rows, LANES)

    # Tile choice: >= TARGET_GRID_STEPS steps when possible (megacore/v7x),
    # dtype-aware sublane rounding, capped at ~8 MiB per block. The last
    # block may be partial; Pallas drops its out-of-bounds writes.
    tile_rows = _round_up(max(1, pl.cdiv(rows, TARGET_GRID_STEPS)), granule)
    tile_rows = max(granule, min(MAX_TILE_ROWS, tile_rows))
    grid = (pl.cdiv(rows, tile_rows),)

    # Scalar params packed into a tiny SMEM array [w, b].
    wb = jnp.concatenate([weight.reshape(-1), bias.reshape(-1)]).astype(dtype)

    y_slab = pl.pallas_call(
        linear_kernel,
        out_shape=jax.ShapeDtypeStruct((rows, LANES), dtype),
        grid=grid,
        in_specs=[
            pl.BlockSpec(memory_space=pltpu.MemorySpace.SMEM),   # wb scalars
            pl.BlockSpec((tile_rows, LANES), lambda i: (i, 0)),  # x slab tile
        ],
        out_specs=pl.BlockSpec((tile_rows, LANES), lambda i: (i, 0)),
        compiler_params=pltpu.CompilerParams(
            dimension_semantics=("parallel",),
            vmem_limit_bytes=VMEM_LIMIT_BYTES,
        ),
    )(wb, x_slab)

    y_flat = y_slab.reshape(-1)
    if pad:                                      # drop only the padded tail
        y_flat = y_flat[:total]
    return y_flat.reshape(n, out_features)


linear_forward = jax.jit(_linear_forward)


if __name__ == "__main__":
    key = jax.random.PRNGKey(0)
    kx1, kw, kb, kx2, kx3 = jax.random.split(key, 5)

    IN, OUT = 1, 1
    # nn.Linear(1, 1) default init: U(-1/sqrt(in), 1/sqrt(in)) with in = 1.
    bound = 1.0 / (IN ** 0.5)
    weight = jax.random.uniform(kw, (OUT, IN), jnp.float32, -bound, bound)
    bias = jax.random.uniform(kb, (OUT,), jnp.float32, -bound, bound)

    # Fast path: N % 128 == 0 -> zero-copy reshape, multi-step parallel grid.
    N1 = 2048
    x1 = jax.random.normal(kx1, (N1, IN), dtype=jnp.float32)
    y1 = linear_forward(x1, weight, bias)
    jax.block_until_ready(y1)
    assert y1.shape == (N1, OUT)
    assert jnp.allclose(y1, x1 @ weight.T + bias, atol=1e-6, rtol=1e-6)

    # Ragged path: pads <128 elements, partial last block handled by Pallas.
    N2 = 1000
    x2 = jax.random.normal(kx2, (N2, IN), dtype=jnp.float32)
    y2 = linear_forward(x2, weight, bias)
    jax.block_until_ready(y2)
    assert y2.shape == (N2, OUT)
    assert jnp.allclose(y2, x2 @ weight.T + bias, atol=1e-6, rtol=1e-6)

    # Tiny batch: exercises clipped DMAs when rows < one block of sublanes.
    N3 = 8
    x3 = jax.random.normal(kx3, (N3, IN), dtype=jnp.float32)
    y3 = linear_forward(x3, weight, bias)
    jax.block_until_ready(y3)
    assert y3.shape == (N3, OUT)
    assert jnp.allclose(y3, x3 @ weight.T + bias, atol=1e-6, rtol=1e-6)

    print("KERNEL_OK")
</pallas_src>

<mosaic_0001>
module attributes {stable_mosaic.version = 11 : i64} {
  func.func @linear_kernel(%arg0: i32, %arg1: memref<2xf32, #tpu.memory_space<smem>>, %arg2: memref<8x128xf32, #tpu.memory_space<vmem>>, %arg3: memref<8x128xf32, #tpu.memory_space<vmem>>) attributes {dimension_semantics = [#tpu.dimension_semantics<parallel>], iteration_bounds = array<i64: 2>, scalar_prefetch = 0 : i64, scratch_operands = 0 : i64, tpu.core_type = #tpu.core_type<tc>, window_params = [{transform_indices = @transform_0, window_bounds = array<i64: 2>}, {transform_indices = @transform_1, window_bounds = array<i64: 8, 128>}, {transform_indices = @transform_2, window_bounds = array<i64: 8, 128>}]} {
    %c0 = arith.constant 0 : index
    %0 = memref.load %arg1[%c0] : memref<2xf32, #tpu.memory_space<smem>>
    %c1 = arith.constant 1 : index
    %1 = memref.load %arg1[%c1] : memref<2xf32, #tpu.memory_space<smem>>
    %c0_0 = arith.constant 0 : index
    %c0_1 = arith.constant 0 : index
    %2 = vector.load %arg2[%c0_0, %c0_1] : memref<8x128xf32, #tpu.memory_space<vmem>>, vector<8x128xf32>
    %3 = vector.broadcast %0 : f32 to vector<8x128xf32>
    %4 = arith.mulf %2, %3 : vector<8x128xf32>
    %5 = vector.broadcast %1 : f32 to vector<8x128xf32>
    %6 = arith.addf %4, %5 : vector<8x128xf32>
    %c0_2 = arith.constant 0 : index
    %c0_3 = arith.constant 0 : index
    %7 = vector.load %arg3[%c0_2, %c0_3] : memref<8x128xf32, #tpu.memory_space<vmem>>, vector<8x128xf32>
    tpu.vector_store %arg3[%c0_2, %c0_3], %6 {strides = array<i32>} : memref<8x128xf32, #tpu.memory_space<vmem>>, vector<8x128xf32>,
    return
  }
  func.func @transform_0(%arg0: i32) -> i32 {
    %c0_i32 = arith.constant 0 : i32
    %c0_i32_0 = arith.constant 0 : i32
    return %c0_i32 : i32
  }
  func.func @transform_1(%arg0: i32) -> (i32, i32) {
    %c0_i32 = arith.constant 0 : i32
    %c0_i32_0 = arith.constant 0 : i32
    return %arg0, %c0_i32 : i32, i32
  }
  func.func @transform_2(%arg0: i32) -> (i32, i32) {
    %c0_i32 = arith.constant 0 : i32
    %c0_i32_0 = arith.constant 0 : i32
    return %arg0, %c0_i32 : i32, i32
  }
}

</mosaic_0001>

<bundles_post_ra>
// kernel: _linear_forward.1
= control target key start
LH: loop header
LB: loop body
LE: loop exit
PB: predicated region body
PF: predicated region fallthrough
CT: control target
= control target key end

     0   :  { %7 = vsyncpa [#allocation5], 0  ;;  %s652_s0 = inlined_call_operand.vmem [shape: f32[2], index: 0, kind: input, shape index: {}]   ;;  %s653_s1 = inlined_call_operand.hbm [shape: f32[16,128], index: 1, kind: input, shape index: {}]   ;;  %s654_s2 = inlined_call_operand.hbm [shape: f32[16,128], index: 2, kind: output, shape index: {}]  }
   0x1   :  { %8 = vsyncpa [#allocation3], 0 }
   0x2   :  { %10 = vsyncpa [#allocation3 + $0x1], 0 }
   0x3   :  { %11 = vsyncpa [#allocation4], 0 }
   0x4   :  { %13 = vsyncpa [#allocation4 + $0x1], 0  ;;  %s480_s9 = smov 0   ;;  %s482_s10 = smov 0  }
   0x5   :  { %s484_s11 = smov 0   ;;  %s486_s12 = smov 0  }
   0x6 LB: > { %s501_s13 = sadd.s32 4294967295, %s460_s12   ;;  %s277_s14 = sadd.s32 4294967294, %s460_s12   ;;  %s460_s12 = sphi %s486_s12, %s677_s12   ;;  %s456_s11 = sphi %s484_s11, %s676_s11   ;;  %s452_s10 = sphi %s482_s10, %s675_s10   ;;  %s448_s9 = sphi %s480_s9, %s674_s9  }
   0x7   : > { %p60_p0 = scmp.ne.s32.totalorder %s452_s10, %s448_s9  ;;  %p655_p1 = scmp.eq.s32.totalorder %s501_s13, 0 }
   0x8   : > { %p90_p3 = scmp.eq.s32.totalorder %s277_s14, 1  ;;  %p278_p5 = scmp.ge.s32.totalorder %s460_s12, 1 }
   0x9   : > { %p510_p4 = por %p655_p1, %p60_p0  ;;  %p97_p7 = scmp.lt.s32.totalorder %s460_s12, 3 }
   0xa   : > { %p515_p6 = por %p90_p3, %p60_p0  ;;  %s110_s19 = sshll.u32 %s652_s0, 4  ;;  %s111_s19 = int_to_ptr.vmem [resolvable:$true] %s110_s19 }
   0xb   : > { %s659_s15 = scalar_select %p510_p4, 1, 0 }
   0xc   : > { %s660_s16 = scalar_select %p515_p6, 1, 0 }
   0xd   : > { %p523_p8 = pnand %p278_p5, %p97_p7  ;;  %s531_s21 = sadd.s32 1, %s460_s12  }
   0xe   : > { %s44_s23 = ssub.s32 %s460_s12, %s531_s21  ;;  %s47_s25 = sadd.s32 1, %s456_s11 }
   0xf   : > { %s661_s20 = scalar_select %p523_p8, 1, 0 }
  0x10   : > { %p300_p10 = pneg %p523_p8  ;;  %p541_p12 = scmp.eq.s32.totalorder %s44_s23, 0 }
  0x11   : > { %p54_p13 = scmp.ne.s32.totalorder %s456_s11, %s452_s10  ;;  %s349_s26 = scalar_lea.vmem %s111_s19, 16 }
  0x12   : > { %p535_p11 = pnand %p300_p10, %p655_p1  ;;  %p350_p0 = scmp.ne.s32.totalorder %s111_s19, %s349_s26 }
  0x13   : > { %p357_p9 = scmp.lt.s32.totalorder %s111_s19, %s111_s19  ;;  %p358_p2 = scmp.lt.s32.totalorder %s349_s26, %s349_s26 }
  0x14   : > { %p351_p3 = pneg %p535_p11 }
  0x15   : > { %p359_p10 = por %p358_p2, %p357_p9 }
  0x16   : > { %p352_p5 = pnand %p351_p3, %p350_p0 }
  0x18   : > { %p353_p7 = pneg %p352_p5 }
  0x1a   : > { %p360_p1 = pnand %p359_p10, %p353_p7 }
  0x1c   : > { %363 = shalt.err (!%p360_p1)
}
  0x1d   : > { %s462_s27 = smov [#allocation2]   ;;  %p55_p2 = scmp.eq.s32.totalorder %s460_s12, 0 }
  0x1e   : > { %303 = dma.vmem_to_smem (!%p535_p11), %s111_s19, 16, %s462_s27, [#allocation5]  }
  0x1f   : > { %s555_s28 = scalar_select %p541_p12, %s456_s11, %s47_s25  }
  0x20   : > { %p664_p1 = scmp.eq.s32.totalorder %s501_s13, 1  ;;  %p313_p0 = scmp.lt.s32.totalorder %s460_s12, 2 }
  0x21   : > { %s121_s30 = sand.u32 1, %s456_s11   ;;  %p56_p3 = por %p55_p2, %p54_p13 }
  0x22   : > { %p563_p9 = por %p664_p1, %p54_p13  ;;  %s281_s3 = sshll.u32 %s121_s30, 3 }
  0x23   : > { %s282_s4 = sshll.u32 %s460_s12, 7  ;;  %s125_s8 = scalar_lea.vmem [#allocation6], %s281_s3 }
  0x24   : > { %s665_s29 = scalar_select %p563_p9, 1, 0 }
  0x25   : > { %s576_s7 = scalar_lea.hbm %s653_s1, %s282_s4  ;;  %s132_s14 = sshll.u32 %s125_s8, 4  ;;  %s133_s14 = int_to_ptr.vmem [resolvable:$true] %s132_s14 }
  0x26   : > { %p578_p11 = pnand %p313_p0, %p56_p3  ;;  %s122_s18 = scalar_lea.sflag [#allocation3], %s121_s30 }
  0x27   : > { %s364_s19 = scalar_lea.hbm %s576_s7, 128  ;;  %s369_s24 = scalar_lea.hbm %s653_s1, 256 }
  0x28   : > { %p365_p12 = scmp.ne.s32.totalorder %s576_s7, %s364_s19  ;;  %p366_p13 = pneg %p578_p11 }
  0x29   : > { %p370_p10 = scmp.lt.s32.totalorder %s576_s7, %s653_s1  ;;  %p371_p2 = scmp.lt.s32.totalorder %s369_s24, %s364_s19 }
  0x2a   : > { %p367_p5 = pnand %p366_p13, %p365_p12 }
  0x2b   : > { %p372_p1 = por %p371_p2, %p370_p10 }
  0x2c   : > { %p368_p7 = pneg %p367_p5 }
  0x2e   : > { %p373_p0 = pnand %p372_p1, %p368_p7 }
  0x30   : > { %376 = shalt.err (!%p373_p0)
}
  0x31   : > { %s377_s27 = scalar_lea.vmem %s133_s14, 128  ;;  %s463_s30 = smov [#allocation6]  }
  0x32   : > { %p378_p3 = scmp.ne.s32.totalorder %s133_s14, %s377_s27  ;;  %s382_s3 = sshll.u32 %s463_s30, 4  ;;  %s383_s3 = int_to_ptr.vmem [resolvable:$false] %s382_s3 }
  0x33   : > { %s384_s4 = scalar_lea.vmem %s383_s3, 256  ;;  %p385_p12 = scmp.lt.s32.totalorder %s133_s14, %s383_s3 }
  0x34   : > { %p380_p6 = pnand %p378_p3, %p366_p13  ;;  %p386_p5 = scmp.lt.s32.totalorder %s384_s4, %s377_s27 }
  0x36   : > { %p381_p9 = pneg %p380_p6  ;;  %p387_p4 = por %p386_p5, %p385_p12 }
  0x38   : > { %p388_p8 = pnand %p387_p4, %p381_p9 }
  0x3a   : > { %391 = shalt.err (!%p388_p8)
}
  0x3b   : > { %307 = dma.hbm_to_vmem [thread:$0]  (!%p578_p11), %s576_s7, 128, %s133_s14, %s122_s18  }
  0x3c   : > { %p667_p7 = scmp.ne.s32.totalorder %s661_s20, 0 }
  0x3d   : > { %p668_p10 = scmp.eq.s32.totalorder (!%p667_p7), %s501_s13, 0 }
  0x3e   : > { %141 = sbr.rel (%p667_p7) target bundleno = 100 (0x64), region = 28 }
  0x43   : > { %435 = dma.done.wait (%p668_p10), [#allocation5], 16   ;;  %p669_p6 = pmov %p668_p10 }
  0x44   : > { %s603_s5 = sand.u32 1, %s452_s10   ;;  %p670_p4 = scmp.ne.s32.totalorder %s659_s15, 0 }
  0x45   : > { %437 = vsyncadd (%p669_p6), [#allocation5], 4294967280  ;;  %s285_s6 = sshll.u32 %s603_s5, 3  ;;  %s148_s8 = scalar_lea.sflag [#allocation3], %s603_s5 }
  0x46   : > { %s151_s17 = scalar_lea.vmem [#allocation6], %s285_s6 }
  0x47   : > { %439 = dma.done.wait (%p670_p4), %s148_s8, 128  }
  0x48   : > { %441 = vsyncadd (%p670_p4), %s148_s8, 4294967168 }
  0x49   : > { %156 = sfence }
  0x4a   : > { %s173_s20 = sld [smem:[#allocation2]]  ;;  %v175_v0 = vld [vmem:[%s151_s17] sm:$0xff]  ;;  %s172_s14 = scalar_lea.vmem [#allocation7], %s285_s6 }
  0x4b   : > { %s287_s7 = sld [smem:[#allocation2 + $0x1]]  ;;  %s195_s18 = sshll.u32 %s172_s14, 4  ;;  %s612_s18 = int_to_ptr.vmem [resolvable:$true] %s195_s18 }
  0x4c   : > { %s289_s19 = sshll.u32 %s501_s13, 7  ;;  %s182_s24 = scalar_lea.sflag [#allocation4], %s603_s5 }
  0x4d   : > { %s193_s23 = scalar_lea.hbm %s654_s2, %s289_s19  ;;  %s392_s25 = scalar_lea.vmem %s612_s18, 128 }
  0x4e   : > { %p393_p8 = scmp.ne.s32.totalorder %s612_s18, %s392_s25  ;;  %p671_p9 = scmp.ne.s32.totalorder %s665_s29, 0 }
  0x4f   : > { %s464_s13 = smov [#allocation7]  }
  0x50   : > { %v176_v1 = vstv %s173_s20  ;;  %p394_p11 = pnand %p393_p8, %p671_p9  ;;  %s396_s26 = sshll.u32 %s464_s13, 4  ;;  %s397_s26 = int_to_ptr.vmem [resolvable:$false] %s396_s26 }
  0x51   : > { %v177_v2 = vmul.f32 %v176_v1, %v175_v0  ;;  %v178_v3 = vstv %s287_s7  ;;  %s398_s27 = scalar_lea.vmem %s397_s26, 256  ;;  %p399_p2 = scmp.lt.s32.totalorder %s612_s18, %s397_s26 }
  0x52   : > { %p395_p13 = pneg %p394_p11  ;;  %p400_p1 = scmp.lt.s32.totalorder %s398_s27, %s392_s25 }
  0x53   : > { %v179_v4 = vadd.f32 %v178_v3, %v177_v2 }
  0x54   : > { %p401_p0 = por %p400_p1, %p399_p2 }
  0x55   : > { %180 = vst [vmem:[%s172_s14] sm:$0xff] %v179_v4 }
  0x56   : > { %p402_p3 = pnand %p401_p0, %p395_p13 }
  0x58   : > { %405 = shalt.err (!%p402_p3)
}
  0x59   : > { %s406_s30 = scalar_lea.hbm %s193_s23, 128  ;;  %s410_s5 = scalar_lea.hbm %s654_s2, 256 }
  0x5a   : > { %p407_p12 = scmp.ne.s32.totalorder %s193_s23, %s406_s30  ;;  %p411_p10 = scmp.lt.s32.totalorder %s193_s23, %s654_s2 }
  0x5b   : > { %p412_p6 = scmp.lt.s32.totalorder %s410_s5, %s406_s30 }
  0x5c   : > { %p408_p5 = pnand %p407_p12, %p671_p9 }
  0x5d   : > { %p413_p4 = por %p412_p6, %p411_p10 }
  0x5e   : > { %p409_p7 = pneg %p408_p5 }
  0x60   : > { %p414_p8 = pnand %p413_p4, %p409_p7 }
  0x62   : > { %417 = shalt.err (!%p414_p8)
}
  0x63   : > { %298 = dma.vmem_to_hbm [thread:$0]  (%p671_p9), %s612_s18, 128, %s193_s23, %s182_s24  }
  0x64 PF: > { %s207_s17 = sand.u32 1, %s448_s9   ;;  %p672_p11 = scmp.ne.s32.totalorder %s660_s16, 0 }
  0x65   : > { %p673_p13 = scmp.ge.s32.totalorder %s460_s12, 2  ;;  %s208_s20 = scalar_lea.sflag [#allocation4], %s207_s17 }
  0x67   : > { %p309_p2 = pnand %p673_p13, %p672_p11 }
  0x69   : > { %p310_p1 = pneg %p309_p2 }
  0x6b   : > { %443 = dma.done.wait (%p310_p1), %s208_s20, 128  }
  0x6c   : > { %445 = vsyncadd (%p310_p1), %s208_s20, 4294967168  ;;  %p16_p0 = scmp.ge.s32.totalorder %s531_s21, 4   ;;  %s674_s9 = smov %s452_s10 }
  0x6d   : > { %s675_s10 = smov %s456_s11  ;;  %s676_s11 = smov %s555_s28 }
  0x6e   : > { %s677_s12 = smov %s531_s21  ;;  %18 = sbr.rel (!%p16_p0) target bundleno = 6 (0x6), region = 78 }
  0x73   :  { %213 = vsyncpa [#allocation3], 1 }
  0x74   :  { %215 = vsyncpa [#allocation3 + $0x1], 1 }
  0x75   :  { %216 = vsyncpa [#allocation4], 1 }
  0x76   :  { %218 = vsyncpa [#allocation4 + $0x1], 1 }
  0x77   :  { %219 = vsyncpa [#allocation5], 1 }
  0x78   :  { %221 = vsyncpa [#allocation5 + $0x1], 1 }

</bundles_post_ra>
